<compile_context>
chip_gen: v7x
topology: tpu7x:2x2x1
jax: 0.10.0
libtpu: 0.0.40
codegen_flags: <defaults>
</compile_context>

<pallas_src>
import functools

import numpy as np
import jax
import jax.numpy as jnp
from jax.experimental import pallas as pl
from jax.experimental.pallas import tpu as pltpu


# ----------------------------------------------------------------------------------------------
# Fused FFN kernel: linear1 -> ReLU -> linear2 (accumulated over d_ffn chunks) -> +res -> LN
# ----------------------------------------------------------------------------------------------

def _ffn_kernel(x_ref, w1_ref, b1_ref, w2_ref, b2_ref, g_ref, beta_ref, o_ref,
                xin_ref, acc_ref, *, normalize_before, eps):
    """Grid = (M tiles, d_ffn chunks).  The d_ffn axis is a reduction: partial linear2 products
    are accumulated into acc_ref; bias2 + residual + LayerNorm run on the last chunk."""
    j = pl.program_id(1)
    nj = pl.num_programs(1)

    def layer_norm(v):                                   # f32 statistics == torch.nn.LayerNorm
        mu = jnp.mean(v, axis=-1, keepdims=True)
        d = v - mu
        var = jnp.mean(d * d, axis=-1, keepdims=True)
        return d * jax.lax.rsqrt(var + eps) * g_ref[...] + beta_ref[...]

    @pl.when(j == 0)
    def _init():
        x = x_ref[...].astype(jnp.float32)
        ffn_in = layer_norm(x) if normalize_before else x
        xin_ref[...] = ffn_in.astype(xin_ref.dtype)      # matmul LHS (bf16), reused per chunk
        acc_ref[...] = jnp.zeros_like(acc_ref)

    # linear1 chunk (MXU, f32 accumulation); bias + ReLU epilogue in b1's dtype
    # (bf16 on v6e/v7x, f32 on <=v5).  Dropout is the identity at inference.
    h = jnp.dot(xin_ref[...], w1_ref[...], preferred_element_type=jnp.float32)
    h = h.astype(b1_ref.dtype) + b1_ref[...]
    h = jnp.maximum(h, 0)

    # linear2 chunk: accumulate in f32; the hidden activation never leaves VMEM.
    acc_ref[...] += jnp.dot(h.astype(w2_ref.dtype), w2_ref[...],
                            preferred_element_type=jnp.float32)

    @pl.when(j == nj - 1)
    def _finalize():
        x = x_ref[...].astype(jnp.float32)
        s = x + acc_ref[...] + b2_ref[...]               # residual add (dropout = identity)
        out = s if normalize_before else layer_norm(s)
        o_ref[...] = out.astype(o_ref.dtype)


# ----------------------------------------------------------------------------------------------
# Wrapper
# ----------------------------------------------------------------------------------------------

def _round_up(n, m):
    return (n + m - 1) // m * m


def _default_hidden_dtype():
    """bf16 epilogue only on chips with a bf16 VPU (v6e / v7x); f32 on earlier generations."""
    try:
        kind = jax.devices()[0].device_kind.lower()
    except Exception:
        return jnp.bfloat16
    for tag in ("v2", "v3", "v4", "v5"):
        if tag in kind:
            return jnp.float32
    return jnp.bfloat16


def ffn_layer_forward(params, tgt, *, normalize_before=False, tile_m=1024, tile_f=None,
                      compute_dtype=jnp.bfloat16, hidden_dtype=None, out_dtype=None, eps=1e-5):
    """Fused FFNLayer forward.  tgt: (..., d_model) float array in its native dtype."""
    lead = tgt.shape[:-1]
    d_model = tgt.shape[-1]
    d_ffn = params["w1"].shape[1]
    m = int(np.prod(lead)) if lead else 1
    x = tgt.reshape(m, d_model)                          # native dtype; upcast happens in-kernel

    if out_dtype is None:
        out_dtype = tgt.dtype                            # bf16 in -> bf16 out (halves writeback)
    if hidden_dtype is None:
        hidden_dtype = _default_hidden_dtype()

    # Token-axis tile: 16-aligned (bf16 sublane packing), capped so the M grid has >=2 steps
    # whenever possible (v7x megacore + DMA/compute overlap).  Ragged last block is masked.
    align = 16
    tm = max(align, (int(tile_m) // align) * align)
    if m > align:
        tm = min(tm, _round_up(pl.cdiv(m, 2), align))
    tm = min(tm, _round_up(m, align))
    grid_m = pl.cdiv(m, tm)

    # Hidden-dim chunking only in the small-tile (weight-DMA-bound) regime; at large M keep the
    # weights whole + resident so they're DMA'd exactly once.
    if tile_f is None:
        tile_f = 512 if tm < 512 else d_ffn
    if 0 < tile_f < d_ffn and d_ffn % tile_f == 0 and tile_f % 128 == 0:
        tf = int(tile_f)
    else:
        tf = d_ffn
    grid_f = d_ffn // tf

    # Weights stored bf16 (halves weight HBM traffic); b1 in the epilogue dtype; b2 / LN affine f32.
    w1 = params["w1"].astype(compute_dtype)              # (D, F)  == torch weight.T
    w2 = params["w2"].astype(compute_dtype)              # (F, D)
    b1 = params["b1"].reshape(1, d_ffn).astype(hidden_dtype)
    b2 = params["b2"].reshape(1, d_model).astype(jnp.float32)
    gamma = params["ln_g"].reshape(1, d_model).astype(jnp.float32)
    beta = params["ln_b"].reshape(1, d_model).astype(jnp.float32)

    kernel = functools.partial(_ffn_kernel, normalize_before=normalize_before, eps=eps)
    out = pl.pallas_call(
        kernel,
        grid=(grid_m, grid_f),
        in_specs=[
            pl.BlockSpec((tm, d_model), lambda i, j: (i, 0)),    # x tile (same block over j)
            pl.BlockSpec((d_model, tf), lambda i, j: (0, j)),    # w1 chunk
            pl.BlockSpec((1, tf), lambda i, j: (0, j)),          # b1 chunk
            pl.BlockSpec((tf, d_model), lambda i, j: (j, 0)),    # w2 chunk
            pl.BlockSpec((1, d_model), lambda i, j: (0, 0)),     # b2 (resident)
            pl.BlockSpec((1, d_model), lambda i, j: (0, 0)),     # LN gamma
            pl.BlockSpec((1, d_model), lambda i, j: (0, 0)),     # LN beta
        ],
        out_specs=pl.BlockSpec((tm, d_model), lambda i, j: (i, 0)),
        out_shape=jax.ShapeDtypeStruct((m, d_model), out_dtype),
        scratch_shapes=[
            pltpu.VMEM((tm, d_model), compute_dtype),            # ffn input (x or LN(x)), bf16
            pltpu.VMEM((tm, d_model), jnp.float32),              # linear2 accumulator
        ],
        compiler_params=pltpu.CompilerParams(
            dimension_semantics=("parallel", "arbitrary"),       # M shardable across v7x TCs
            vmem_limit_bytes=48 * 1024 * 1024,                   # v5e default scoped limit is 16 MiB
        ),
    )(x, w1, b1, w2, b2, gamma, beta)

    return out.reshape(*lead, d_model)


# ----------------------------------------------------------------------------------------------
# Pure-JAX f32 reference (mirrors the PyTorch module exactly) + parameter init
# ----------------------------------------------------------------------------------------------

def ffn_layer_ref(params, tgt, normalize_before=False, eps=1e-5):
    def ln(v):
        mu = jnp.mean(v, axis=-1, keepdims=True)
        d = v - mu
        var = jnp.mean(d * d, axis=-1, keepdims=True)
        return d * jax.lax.rsqrt(var + eps) * params["ln_g"] + params["ln_b"]

    x = tgt.astype(jnp.float32)
    ffn_in = ln(x) if normalize_before else x
    h = jnp.maximum(ffn_in @ params["w1"] + params["b1"], 0.0)
    y = h @ params["w2"] + params["b2"]
    s = x + y
    return s if normalize_before else ln(s)


def init_ffn_params(key, d_model, d_ffn):
    """Matches nn.Linear + _reset_parameters (xavier_uniform on weights, default bias init)."""
    k1, k2, k3, k4 = jax.random.split(key, 4)

    def xavier(k, din, dout):
        a = float(np.sqrt(6.0 / (din + dout)))
        return jax.random.uniform(k, (din, dout), jnp.float32, -a, a)

    def bias(k, fan_in, n):
        a = 1.0 / float(np.sqrt(fan_in))
        return jax.random.uniform(k, (n,), jnp.float32, -a, a)

    return dict(
        w1=xavier(k1, d_model, d_ffn), b1=bias(k2, d_model, d_ffn),
        w2=xavier(k3, d_ffn, d_model), b2=bias(k4, d_ffn, d_model),
        ln_g=jnp.ones((d_model,), jnp.float32),
        ln_b=jnp.zeros((d_model,), jnp.float32),
    )


# ----------------------------------------------------------------------------------------------
# Demo (small shapes; real model uses d_model=256, d_ffn=2048, NQ*B ~ 400)
# ----------------------------------------------------------------------------------------------

if __name__ == "__main__":
    key = jax.random.PRNGKey(0)
    NQ, B, D, F = 48, 2, 32, 64
    k_params, k_x = jax.random.split(key)

    params = init_ffn_params(k_params, D, F)
    tgt = jax.random.normal(k_x, (NQ, B, D), jnp.float32)   # (num_queries, batch, d_model)

    run_post = jax.jit(functools.partial(ffn_layer_forward, params, normalize_before=False))
    run_pre = jax.jit(functools.partial(ffn_layer_forward, params, normalize_before=True))

    out_post = run_post(tgt)
    out_pre = run_pre(tgt)
    jax.block_until_ready((out_post, out_pre))

    ref_post = ffn_layer_ref(params, tgt, normalize_before=False)
    ref_pre = ffn_layer_ref(params, tgt, normalize_before=True)

    assert out_post.shape == tgt.shape and out_pre.shape == tgt.shape
    assert not bool(jnp.any(jnp.isnan(out_post))) and not bool(jnp.any(jnp.isnan(out_pre)))
    # bf16 matmul operands / bf16 bias+ReLU epilogue with f32 accumulation vs pure-f32 reference
    err_post = float(jnp.max(jnp.abs(out_post.astype(jnp.float32) - ref_post)))
    err_pre = float(jnp.max(jnp.abs(out_pre.astype(jnp.float32) - ref_pre)))
    assert err_post < 1e-1, f"post-norm mismatch: {err_post}"
    assert err_pre < 1e-1, f"pre-norm mismatch: {err_pre}"

    print("KERNEL_OK")
</pallas_src>

<mosaic_0001>
module attributes {stable_mosaic.version = 11 : i64} {
  func.func @_ffn_kernel(%arg0: i32, %arg1: i32, %arg2: memref<48x32xf32, #tpu.memory_space<vmem>>, %arg3: memref<32x64xbf16, #tpu.memory_space<vmem>>, %arg4: memref<1x64xbf16, #tpu.memory_space<vmem>>, %arg5: memref<64x32xbf16, #tpu.memory_space<vmem>>, %arg6: memref<1x32xf32, #tpu.memory_space<vmem>>, %arg7: memref<1x32xf32, #tpu.memory_space<vmem>>, %arg8: memref<1x32xf32, #tpu.memory_space<vmem>>, %arg9: memref<48x32xf32, #tpu.memory_space<vmem>>, %arg10: memref<48x32xbf16, #tpu.memory_space<vmem>>, %arg11: memref<48x32xf32, #tpu.memory_space<vmem>>) attributes {dimension_semantics = [#tpu.dimension_semantics<parallel>, #tpu.dimension_semantics<arbitrary>], iteration_bounds = array<i64: 2, 1>, scalar_prefetch = 0 : i64, scratch_operands = 2 : i64, tpu.core_type = #tpu.core_type<tc>, window_params = [{transform_indices = @transform_0, window_bounds = array<i64: 48, 32>}, {transform_indices = @transform_1, window_bounds = array<i64: 32, 64>}, {transform_indices = @transform_2, window_bounds = array<i64: 1, 64>}, {transform_indices = @transform_3, window_bounds = array<i64: 64, 32>}, {pipeline_mode = #tpu.pipeline_mode<synchronous>, transform_indices = @transform_4, window_bounds = array<i64: 1, 32>}, {pipeline_mode = #tpu.pipeline_mode<synchronous>, transform_indices = @transform_5, window_bounds = array<i64: 1, 32>}, {pipeline_mode = #tpu.pipeline_mode<synchronous>, transform_indices = @transform_6, window_bounds = array<i64: 1, 32>}, {transform_indices = @transform_7, window_bounds = array<i64: 48, 32>}]} {
    %c0_i32 = arith.constant 0 : i32
    %0 = arith.cmpi eq, %arg1, %c0_i32 : i32
    %1 = arith.extui %0 : i1 to i32
    %c0_i32_0 = arith.constant 0 : i32
    %2 = arith.cmpi ne, %1, %c0_i32_0 : i32
    scf.if %2 {
      %c0_16 = arith.constant 0 : index
      %c0_17 = arith.constant 0 : index
      %20 = vector.load %arg2[%c0_16, %c0_17] : memref<48x32xf32, #tpu.memory_space<vmem>>, vector<48x32xf32>
      %21 = arith.truncf %20 : vector<48x32xf32> to vector<48x32xbf16>
      %c0_18 = arith.constant 0 : index
      %c0_19 = arith.constant 0 : index
      %22 = vector.load %arg10[%c0_18, %c0_19] : memref<48x32xbf16, #tpu.memory_space<vmem>>, vector<48x32xbf16>
      tpu.vector_store %arg10[%c0_18, %c0_19], %21 {strides = array<i32>} : memref<48x32xbf16, #tpu.memory_space<vmem>>, vector<48x32xbf16>,
      %cst_20 = arith.constant 0.000000e+00 : f32
      %23 = vector.broadcast %cst_20 : f32 to vector<48x32xf32>
      %c0_21 = arith.constant 0 : index
      %c0_22 = arith.constant 0 : index
      %24 = vector.load %arg11[%c0_21, %c0_22] : memref<48x32xf32, #tpu.memory_space<vmem>>, vector<48x32xf32>
      tpu.vector_store %arg11[%c0_21, %c0_22], %23 {strides = array<i32>} : memref<48x32xf32, #tpu.memory_space<vmem>>, vector<48x32xf32>,
    } else {
    }
    %c0 = arith.constant 0 : index
    %c0_1 = arith.constant 0 : index
    %3 = vector.load %arg10[%c0, %c0_1] : memref<48x32xbf16, #tpu.memory_space<vmem>>, vector<48x32xbf16>
    %c0_2 = arith.constant 0 : index
    %c0_3 = arith.constant 0 : index
    %4 = vector.load %arg3[%c0_2, %c0_3] : memref<32x64xbf16, #tpu.memory_space<vmem>>, vector<32x64xbf16>
    %cst = arith.constant dense<0.000000e+00> : vector<48x64xf32>
    %5 = tpu.matmul %3, %4, %cst {dimension_numbers = #tpu.dot_dimension_numbers<[1], [0], [0], [1], [0, 0, 1, 1], [], []>} : vector<48x32xbf16>, vector<32x64xbf16>, vector<48x64xf32> -> vector<48x64xf32>
    %6 = arith.truncf %5 : vector<48x64xf32> to vector<48x64xbf16>
    %c0_4 = arith.constant 0 : index
    %c0_5 = arith.constant 0 : index
    %7 = vector.load %arg4[%c0_4, %c0_5] : memref<1x64xbf16, #tpu.memory_space<vmem>>, vector<1x64xbf16>
    %8 = vector.broadcast %7 : vector<1x64xbf16> to vector<48x64xbf16>
    %9 = arith.addf %6, %8 : vector<48x64xbf16>
    %cst_6 = arith.constant 0.000000e+00 : bf16
    %10 = vector.broadcast %cst_6 : bf16 to vector<48x64xbf16>
    %11 = arith.maximumf %9, %10 : vector<48x64xbf16>
    %c0_7 = arith.constant 0 : index
    %c0_8 = arith.constant 0 : index
    %12 = vector.load %arg11[%c0_7, %c0_8] : memref<48x32xf32, #tpu.memory_space<vmem>>, vector<48x32xf32>
    %c0_9 = arith.constant 0 : index
    %c0_10 = arith.constant 0 : index
    %13 = vector.load %arg5[%c0_9, %c0_10] : memref<64x32xbf16, #tpu.memory_space<vmem>>, vector<64x32xbf16>
    %cst_11 = arith.constant dense<0.000000e+00> : vector<48x32xf32>
    %14 = tpu.matmul %11, %13, %cst_11 {dimension_numbers = #tpu.dot_dimension_numbers<[1], [0], [0], [1], [0, 0, 1, 1], [], []>} : vector<48x64xbf16>, vector<64x32xbf16>, vector<48x32xf32> -> vector<48x32xf32>
    %15 = arith.addf %12, %14 : vector<48x32xf32>
    %c0_12 = arith.constant 0 : index
    %c0_13 = arith.constant 0 : index
    %16 = vector.load %arg11[%c0_12, %c0_13] : memref<48x32xf32, #tpu.memory_space<vmem>>, vector<48x32xf32>
    tpu.vector_store %arg11[%c0_12, %c0_13], %15 {strides = array<i32>} : memref<48x32xf32, #tpu.memory_space<vmem>>, vector<48x32xf32>,
    %c0_i32_14 = arith.constant 0 : i32
    %17 = arith.cmpi eq, %arg1, %c0_i32_14 : i32
    %18 = arith.extui %17 : i1 to i32
    %c0_i32_15 = arith.constant 0 : i32
    %19 = arith.cmpi ne, %18, %c0_i32_15 : i32
    scf.if %19 {
      %c0_16 = arith.constant 0 : index
      %c0_17 = arith.constant 0 : index
      %20 = vector.load %arg2[%c0_16, %c0_17] : memref<48x32xf32, #tpu.memory_space<vmem>>, vector<48x32xf32>
      %c0_18 = arith.constant 0 : index
      %c0_19 = arith.constant 0 : index
      %21 = vector.load %arg11[%c0_18, %c0_19] : memref<48x32xf32, #tpu.memory_space<vmem>>, vector<48x32xf32>
      %22 = arith.addf %20, %21 : vector<48x32xf32>
      %c0_20 = arith.constant 0 : index
      %c0_21 = arith.constant 0 : index
      %23 = vector.load %arg6[%c0_20, %c0_21] : memref<1x32xf32, #tpu.memory_space<vmem>>, vector<1x32xf32>
      %24 = vector.broadcast %23 : vector<1x32xf32> to vector<48x32xf32>
      %25 = arith.addf %22, %24 : vector<48x32xf32>
      %cst_22 = arith.constant dense<0.000000e+00> : vector<48xf32>
      %26 = vector.multi_reduction <add>, %25, %cst_22 [1] : vector<48x32xf32> to vector<48xf32>
      %27 = vector.shape_cast %26 : vector<48xf32> to vector<48x1xf32>
      %cst_23 = arith.constant 3.200000e+01 : f32
      %28 = vector.broadcast %cst_23 : f32 to vector<48x1xf32>
      %29 = arith.divf %27, %28 : vector<48x1xf32>
      %30 = vector.broadcast %29 : vector<48x1xf32> to vector<48x32xf32>
      %31 = arith.subf %25, %30 : vector<48x32xf32>
      %32 = arith.mulf %31, %31 : vector<48x32xf32>
      %cst_24 = arith.constant dense<0.000000e+00> : vector<48xf32>
      %33 = vector.multi_reduction <add>, %32, %cst_24 [1] : vector<48x32xf32> to vector<48xf32>
      %34 = vector.shape_cast %33 : vector<48xf32> to vector<48x1xf32>
      %cst_25 = arith.constant 3.200000e+01 : f32
      %35 = vector.broadcast %cst_25 : f32 to vector<48x1xf32>
      %36 = arith.divf %34, %35 : vector<48x1xf32>
      %cst_26 = arith.constant 9.99999974E-6 : f32
      %37 = vector.broadcast %cst_26 : f32 to vector<48x1xf32>
      %38 = arith.addf %36, %37 : vector<48x1xf32>
      %39 = math.rsqrt %38 : vector<48x1xf32>
      %40 = vector.broadcast %39 : vector<48x1xf32> to vector<48x32xf32>
      %41 = arith.mulf %31, %40 : vector<48x32xf32>
      %c0_27 = arith.constant 0 : index
      %c0_28 = arith.constant 0 : index
      %42 = vector.load %arg7[%c0_27, %c0_28] : memref<1x32xf32, #tpu.memory_space<vmem>>, vector<1x32xf32>
      %43 = vector.broadcast %42 : vector<1x32xf32> to vector<48x32xf32>
      %44 = arith.mulf %41, %43 : vector<48x32xf32>
      %c0_29 = arith.constant 0 : index
      %c0_30 = arith.constant 0 : index
      %45 = vector.load %arg8[%c0_29, %c0_30] : memref<1x32xf32, #tpu.memory_space<vmem>>, vector<1x32xf32>
      %46 = vector.broadcast %45 : vector<1x32xf32> to vector<48x32xf32>
      %47 = arith.addf %44, %46 : vector<48x32xf32>
      %c0_31 = arith.constant 0 : index
      %c0_32 = arith.constant 0 : index
      %48 = vector.load %arg9[%c0_31, %c0_32] : memref<48x32xf32, #tpu.memory_space<vmem>>, vector<48x32xf32>
      tpu.vector_store %arg9[%c0_31, %c0_32], %47 {strides = array<i32>} : memref<48x32xf32, #tpu.memory_space<vmem>>, vector<48x32xf32>,
    } else {
    }
    return
  }
  func.func @transform_0(%arg0: i32, %arg1: i32) -> (i32, i32) {
    %c0_i32 = arith.constant 0 : i32
    %c0_i32_0 = arith.constant 0 : i32
    return %arg0, %c0_i32 : i32, i32
  }
  func.func @transform_1(%arg0: i32, %arg1: i32) -> (i32, i32) {
    %c0_i32 = arith.constant 0 : i32
    %c0_i32_0 = arith.constant 0 : i32
    return %c0_i32, %arg1 : i32, i32
  }
  func.func @transform_2(%arg0: i32, %arg1: i32) -> (i32, i32) {
    %c0_i32 = arith.constant 0 : i32
    %c0_i32_0 = arith.constant 0 : i32
    return %c0_i32, %arg1 : i32, i32
  }
  func.func @transform_3(%arg0: i32, %arg1: i32) -> (i32, i32) {
    %c0_i32 = arith.constant 0 : i32
    %c0_i32_0 = arith.constant 0 : i32
    return %arg1, %c0_i32 : i32, i32
  }
  func.func @transform_4(%arg0: i32, %arg1: i32) -> (i32, i32) {
    %c0_i32 = arith.constant 0 : i32
    %c0_i32_0 = arith.constant 0 : i32
    %c0_i32_1 = arith.constant 0 : i32
    return %c0_i32, %c0_i32_0 : i32, i32
  }
  func.func @transform_5(%arg0: i32, %arg1: i32) -> (i32, i32) {
    %c0_i32 = arith.constant 0 : i32
    %c0_i32_0 = arith.constant 0 : i32
    %c0_i32_1 = arith.constant 0 : i32
    return %c0_i32, %c0_i32_0 : i32, i32
  }
  func.func @transform_6(%arg0: i32, %arg1: i32) -> (i32, i32) {
    %c0_i32 = arith.constant 0 : i32
    %c0_i32_0 = arith.constant 0 : i32
    %c0_i32_1 = arith.constant 0 : i32
    return %c0_i32, %c0_i32_0 : i32, i32
  }
  func.func @transform_7(%arg0: i32, %arg1: i32) -> (i32, i32) {
    %c0_i32 = arith.constant 0 : i32
    %c0_i32_0 = arith.constant 0 : i32
    return %arg0, %c0_i32 : i32, i32
  }
}

</mosaic_0001>

<bundles_post_ra>
// kernel: ffn_layer_forward.1
= control target key start
LH: loop header
LB: loop body
LE: loop exit
PB: predicated region body
PF: predicated region fallthrough
CT: control target
= control target key end

     0   :  { %s1030_s24 = smov 0   ;;  %s1032_s25 = smov 0   ;;  %s1198_s0 = inlined_call_operand.vmem [shape: f32[96,32], index: 0, kind: input, shape index: {}]   ;;  %s1199_s1 = inlined_call_operand.vmem [shape: bf16[32,64], index: 1, kind: input, shape index: {}]   ;;  %s1200_s2 = inlined_call_operand.vmem [shape: bf16[1,64], index: 2, kind: input, shape index: {}]   ;;  %s1201_s3 = inlined_call_operand.vmem [shape: bf16[64,32], index: 3, kind: input, shape index: {}]   ;;  %s1202_s4 = inlined_call_operand.vmem [shape: f32[1,32], index: 4, kind: input, shape index: {}]   ;;  %s1203_s5 = inlined_call_operand.vmem [shape: f32[1,32], index: 5, kind: input, shape index: {}]   ;;  %s1204_s6 = inlined_call_operand.vmem [shape: f32[1,32], index: 6, kind: input, shape index: {}]   ;;  %s1205_s7 = inlined_call_operand.vmem [shape: f32[96,32], index: 7, kind: output, shape index: {}]  }
   0x1   :  { %s1034_s26 = smov 0  }
   0x2 LB: > { %s29_s27 = sadd.s32 1, %s981_s25  ;;  %p850_p0 = scmp.ge.s32.totalorder %s985_s26, 1  ;;  %s985_s26 = sphi %s1034_s26, %s17_s26   ;;  %s981_s25 = sphi %s1032_s25, %s1207_s25   ;;  %s977_s24 = sphi %s1030_s24, %s1206_s24  }
   0x3   : > { %p31_p1 = scmp.ge.s32.totalorder %s29_s27, 2  ;;  %p278_p2 = scmp.lt.s32.totalorder %s985_s26, 3 }
   0x5   : > { %s1209_s27 = smov (%p31_p1, %s29_s27), 0  ;;  %p279_p3 = pnand %p850_p0, %p278_p2 }
   0x6   : > { %v945_v0 = vld [vmem:[%s1199_s1] sm:$0xff] (!%p279_p3)   ;;  %v987_v1 = vmov (!%p279_p3), 0.0   ;;  %v946_v2 = vld [vmem:[%s1199_s1 + $0x8] sm:$0xff] (!%p279_p3)   ;;  %vm988_vm0 = vmmov (!%p279_p3), 0   ;;  %s322_s9 = smul.u32 (!%p279_p3), 6, %s977_s24  ;;  %vm361_vm1 = vcmask (!%p279_p3), 261120   ;;  %v464_v19 = vlaneseq (!%p279_p3) }
   0x7   : > { %282 = sbr.rel (%p279_p3) target bundleno = 806 (0x326), region = 48  ;;  %882 = vmatprep.subr.bf16.mxu0 (!%p279_p3), %v987_v1  ;;  %898 = vmatprep.subr.bf16.mxu1 (!%p279_p3), %v987_v1  ;;  %365 = vst.msk [vmem:[#allocation3] sm:$0xff] (!%p279_p3), %vm361_vm1, %v987_v1  ;;  %366 = vst.msk [vmem:[#allocation3 + $0x8] sm:$0xff] (!%p279_p3), %vm361_vm1, %v987_v1  ;;  %v947_v3 = vld [vmem:[%s1201_s3] sm:$0xff] (!%p279_p3)   ;;  %v948_v4 = vld [vmem:[%s1201_s3 + $0x8] sm:$0xff] (!%p279_p3)   ;;  %vm512_vm2 = vcmask (!%p279_p3), 523264  }
   0x8   : > { %883 = vmatpush3.bf16.msra.mxu0 (!%p279_p3), %v945_v0  ;;  %886 = vmatprep.mubr.msk.bf16.mxu0 (!%p279_p3), %vm988_vm0, %v987_v1  ;;  %367 = vst.msk [vmem:[#allocation3 + $0x10] sm:$0xff] (!%p279_p3), %vm361_vm1, %v987_v1  ;;  %368 = vst.msk [vmem:[#allocation3 + $0x18] sm:$0xff] (!%p279_p3), %vm361_vm1, %v987_v1  ;;  %p323_p4 = scmp.lt.s32.totalorder (!%p279_p3), %s322_s9, 11  ;;  %v949_v17 = vld [vmem:[%s1201_s3 + $0x10] sm:$0xff] (!%p279_p3)   ;;  %v950_v18 = vld [vmem:[%s1201_s3 + $0x18] sm:$0xff] (!%p279_p3)   ;;  %v465_v20 = vshrl.u32 (!%p279_p3), %v464_v19, 7 }
   0x9   : > { %884 = vmatprep.subr.bf16.mxu0 (!%p279_p3), %v987_v1  ;;  %369 = vst.msk [vmem:[#allocation3 + $0x20] sm:$0xff] (!%p279_p3), %vm361_vm1, %v987_v1  ;;  %370 = vst.msk [vmem:[#allocation3 + $0x28] sm:$0xff] (!%p279_p3), %vm361_vm1, %v987_v1  ;;  %906 = vmatprep.mubr.msk.bf16.mxu1 (!%p279_p3), %vm988_vm0, %v987_v1  ;;  %v460_v21 = vld [vmem:[%s1200_s2] sm:$0x1] (!%p279_p3)  ;;  %v989_v31 = vmov (!%p279_p3), 0  }
   0xa   : > { %899 = vmatpush3.bf16.msra.mxu1 (!%p279_p3), %v947_v3  ;;  %v462_v22 = vpack.i.b16 (!%p279_p3), %v460_v21, %v460_v21  ;;  %v466_v23 = vsub.s32 (!%p279_p3), 0, %v465_v20  ;;  %v865_v62 = vld [vmem:[%s1202_s4] ss:$0 sm:$0xff] (!%p279_p3) }
   0xb   : > { %900 = vmatprep.subr.bf16.mxu1 (!%p279_p3), %v987_v1 }
   0xc   : > { %885 = vmatpush3.bf16.msra.mxu0 (!%p279_p3), %v946_v2  ;;  %v467_v26 = vrot.slane (!%p279_p3), %v462_v22, %v466_v23 }
   0xe   : > { %s1211_s9 = smov (!%p323_p4, %s322_s9), 11  ;;  %901 = vmatpush3.bf16.msra.mxu1 %v948_v4  ;;  %v474_v47 = vld [vmem:[#allocation3] sm:$0xff]  ;;  %v475_v49 = vld [vmem:[#allocation3 + $0x8] sm:$0xff] }
   0xf   : > { %s851_s14 = sshll.u32 %s1211_s9, 3  ;;  %902 = vmatprep.subr.bf16.mxu1 %v987_v1  ;;  %v476_v55 = vld [vmem:[#allocation3 + $0x10] sm:$0xff]  ;;  %v477_v57 = vld [vmem:[#allocation3 + $0x18] sm:$0xff] }
  0x10   : > { %s326_s17 = scalar_lea.vmem %s1198_s0, %s851_s14  ;;  %s1175_s13 = scalar_lea.vmem %s1205_s7, %s851_s14 }
  0x11   : > { %v1091_v5 = vld [vmem:[%s326_s17] sm:$0xff]  ;;  %v1093_v6 = vld [vmem:[%s326_s17 + $0x8] sm:$0xff]  ;;  %v1095_v7 = vld [vmem:[%s326_s17 + $0x10] sm:$0xff] }
  0x12   : > { %v358_v8 = vpack.c.bf16 %v1093_v6, %v1091_v5  ;;  %v1100_v9 = vld [vmem:[%s326_s17 + $0x18] sm:$0xff]  ;;  %v1102_v10 = vld [vmem:[%s326_s17 + $0x20] sm:$0xff]  ;;  %v1104_v11 = vld [vmem:[%s326_s17 + $0x28] sm:$0xff]  ;;  %903 = vmatpush3.bf16.msra.mxu1 %v949_v17 }
  0x13   : > { %v359_v12 = vpack.c.bf16 %v1100_v9, %v1095_v7  ;;  %v360_v13 = vpack.c.bf16 %v1104_v11, %v1102_v10  ;;  %904 = vmatprep.subr.bf16.mxu1 %v987_v1 }
  0x14   : > { %362 = vst.msk [vmem:[#allocation2] sm:$0xff] %vm361_vm1, %v358_v8  ;;  %v478_v8 = vld [vmem:[#allocation3 + $0x20] sm:$0xff] }
  0x15   : > { %363 = vst.msk [vmem:[#allocation2 + $0x8] sm:$0xff] %vm361_vm1, %v359_v12  ;;  %364 = vst.msk [vmem:[#allocation2 + $0x10] sm:$0xff] %vm361_vm1, %v360_v13 }
  0x16   : > { %905 = vmatpush3.bf16.msra.mxu1 %v950_v18 }
  0x1b   : > { %v371_v14 = vld [vmem:[#allocation2] sm:$0xff] }
  0x1c   : > { %887 = vmatmul.mubr.msk.bf16.vlgmr.msra.gmra.mrb[0].mxu0 %vm361_vm1, %v371_v14  ;;  %v372_v15 = vld [vmem:[#allocation2 + $0x8] sm:$0xff]  ;;  %v373_v16 = vld [vmem:[#allocation2 + $0x10] sm:$0xff] }
  0x1d   : > { %890 = vmatprep.mubr.msk.bf16.mxu0 %vm988_vm0, %v987_v1 }
  0x24   : > { %891 = vmatmul.mubr.msk.bf16.gmra.mrb[4].mxu0 %vm361_vm1, %v372_v15  ;;  %v479_v15 = vld [vmem:[#allocation3 + $0x28] sm:$0xff] }
  0x25   : > { %894 = vmatprep.mubr.msk.bf16.mxu0 %vm988_vm0, %v987_v1 }
  0x2c   : > { %895 = vmatmul.mubr.msk.bf16.gmra.mrb[8].mxu0 %vm361_vm1, %v373_v16 }
  0xef   : > { %v434_v24 = vpop.f32.mrb[0].mxu0 }
  0xf0   : > { %v888_v25 = vpop.f32.mrb[1].mxu0 }
  0xf1   : > { %v437_v27 = vpop.f32.mrb[2].mxu0 }
  0xf2   : > { %v457_v28 = vpack.c.bf16 %v437_v27, %v434_v24  ;;  %v889_v29 = vpop.f32.mrb[3].mxu0 }
  0xf4   : > { %v468_v30 = vadd.bf16 %v467_v26, %v457_v28 }
  0xf6   : > { %v471_v32 = vmax.bf16 %v989_v31, %v468_v30 }
  0xf7   : > { %v442_v33 = vpop.f32.mrb[4].mxu0 }
  0xf8   : > { %v892_v34 = vpop.f32.mrb[5].mxu0  ;;  %907 = vmatmul.mubr.msk.bf16.vlgmr.msra.gmra.mrb[0].mxu1 %vm512_vm2, %v471_v32 }
  0xf9   : > { %v445_v35 = vpop.f32.mrb[6].mxu0  ;;  %910 = vmatprep.mubr.msk.bf16.mxu1 %vm988_vm0, %v987_v1 }
  0xfa   : > { %v458_v36 = vpack.c.bf16 %v445_v35, %v442_v33  ;;  %v893_v37 = vpop.f32.mrb[7].mxu0 }
  0xfc   : > { %v469_v38 = vadd.bf16 %v467_v26, %v458_v36 }
  0xfe   : > { %v472_v39 = vmax.bf16 %v989_v31, %v469_v38 }
  0xff   : > { %v450_v40 = vpop.f32.mrb[8].mxu0 }
 0x100   : > { %v896_v41 = vpop.f32.mrb[9].mxu0  ;;  %911 = vmatmul.mubr.msk.bf16.gmra.mrb[4].mxu1 %vm512_vm2, %v472_v39 }
 0x101   : > { %v453_v42 = vpop.f32.mrb[10].mxu0  ;;  %914 = vmatprep.mubr.msk.bf16.mxu1 %vm988_vm0, %v987_v1 }
 0x102   : > { %v459_v43 = vpack.c.bf16 %v453_v42, %v450_v40  ;;  %v897_v44 = vpop.f32.mrb[11].mxu0 }
 0x104   : > { %v470_v45 = vadd.bf16 %v467_v26, %v459_v43 }
 0x106   : > { %v473_v46 = vmax.bf16 %v989_v31, %v470_v45 }
 0x108   : > { %915 = vmatmul.mubr.msk.bf16.gmra.mrb[8].mxu1 %vm512_vm2, %v473_v46 }
 0x1cb   : > { %v556_v48 = vpop.f32.mrb[0].mxu1 }
 0x1cc   : > { %v579_v50 = vadd.f32 %v556_v48, %v474_v47  ;;  %v908_v51 = vpop.f32.mrb[1].mxu1 }
 0x1cd   : > { %v559_v52 = vpop.f32.mrb[2].mxu1 }
 0x1ce   : > { %585 = vst.msk [vmem:[#allocation3] sm:$0xff] %vm361_vm1, %v579_v50  ;;  %v580_v53 = vadd.f32 %v559_v52, %v475_v49  ;;  %v909_v54 = vpop.f32.mrb[3].mxu1 }
 0x1d0   : > { %586 = vst.msk [vmem:[#allocation3 + $0x8] sm:$0xff] %vm361_vm1, %v580_v53 }
 0x1d3   : > { %v564_v56 = vpop.f32.mrb[4].mxu1 }
 0x1d4   : > { %v581_v58 = vadd.f32 %v564_v56, %v476_v55  ;;  %v912_v59 = vpop.f32.mrb[5].mxu1 }
 0x1d5   : > { %v567_v60 = vpop.f32.mrb[6].mxu1  ;;  %v600_v61 = vld [vmem:[#allocation3] sm:$0xff] }
 0x1d6   : > { %587 = vst.msk [vmem:[#allocation3 + $0x10] sm:$0xff] %vm361_vm1, %v581_v58  ;;  %v582_v63 = vadd.f32 %v567_v60, %v477_v57  ;;  %v913_v0 = vpop.f32.mrb[7].mxu1  ;;  %v606_v1 = vadd.f32 %v600_v61, %v1091_v5 }
 0x1d7   : > { %v601_v2 = vld [vmem:[#allocation3 + $0x8] sm:$0xff] }
 0x1d8   : > { %588 = vst.msk [vmem:[#allocation3 + $0x18] sm:$0xff] %vm361_vm1, %v582_v63  ;;  %v619_v3 = vadd.f32 %v865_v62, %v606_v1  ;;  %v607_v4 = vadd.f32 %v601_v2, %v1093_v6 }
 0x1da   : > { %v625_v12 = vsel %vm361_vm1, %v619_v3, 0.0  ;;  %v620_v13 = vadd.f32 %v865_v62, %v607_v4 }
 0x1db   : > { %626 = vadd.xlane.f32.xlu0 %v625_v12  ;;  %v572_v14 = vpop.f32.mrb[8].mxu1 }
 0x1dc   : > { %v583_v16 = vadd.f32 %v572_v14, %v478_v8  ;;  %v916_v17 = vpop.f32.mrb[9].mxu1  ;;  %v628_v21 = vsel %vm361_vm1, %v620_v13, 0.0 }
 0x1dd   : > { %v575_v18 = vpop.f32.mrb[10].mxu1  ;;  %v602_v19 = vld [vmem:[#allocation3 + $0x10] sm:$0xff] }
 0x1de   : > { %589 = vst.msk [vmem:[#allocation3 + $0x20] sm:$0xff] %vm361_vm1, %v583_v16  ;;  %v584_v5 = vadd.f32 %v575_v18, %v479_v15  ;;  %v917_v20 = vpop.f32.mrb[11].mxu1  ;;  %v608_v22 = vadd.f32 %v602_v19, %v1095_v7  ;;  %v866_v16 = vld [vmem:[%s1203_s5] ss:$0 sm:$0xff] }
 0x1df   : > { %629 = vadd.xlane.f32.xlu0 %v628_v21  ;;  %v603_v6 = vld [vmem:[#allocation3 + $0x18] sm:$0xff] }
 0x1e0   : > { %590 = vst.msk [vmem:[#allocation3 + $0x28] sm:$0xff] %vm361_vm1, %v584_v5  ;;  %v621_v23 = vadd.f32 %v865_v62, %v608_v22  ;;  %v609_v24 = vadd.f32 %v603_v6, %v1100_v9  ;;  %v867_v5 = vld [vmem:[%s1204_s6] ss:$0 sm:$0xff] }
 0x1e2   : > { %v631_v25 = vsel %vm361_vm1, %v621_v23, 0.0  ;;  %v622_v26 = vadd.f32 %v865_v62, %v609_v24 }
 0x1e3   : > { %632 = vadd.xlane.f32.xlu1 %v631_v25 }
 0x1e4   : > { %v634_v28 = vsel %vm361_vm1, %v622_v26, 0.0 }
 0x1e5   : > { %v604_v27 = vld [vmem:[#allocation3 + $0x20] sm:$0xff] }
 0x1e6   : > { %v610_v29 = vadd.f32 %v604_v27, %v1102_v10 }
 0x1e7   : > { %635 = vadd.xlane.f32.xlu1 %v634_v28  ;;  %v605_v30 = vld [vmem:[#allocation3 + $0x28] sm:$0xff] }
 0x1e8   : > { %v623_v31 = vadd.f32 %v865_v62, %v610_v29  ;;  %v611_v7 = vadd.f32 %v605_v30, %v1104_v11 }
 0x1ea   : > { %v637_v32 = vsel %vm361_vm1, %v623_v31, 0.0  ;;  %v624_v33 = vadd.f32 %v865_v62, %v611_v7 }
 0x1eb   : > { %638 = vadd.xlane.f32.xlu0 %v637_v32 }
 0x1ec   : > { %v640_v9 = vsel %vm361_vm1, %v624_v33, 0.0 }
 0x1ed   : > { %641 = vadd.xlane.f32.xlu1 %v640_v9 }
 0x268   : > { %v627_v34 = vpop.xlane.xlu0 %626 }
 0x269   : > { %v644_v35 = vmul.f32 0.03125, %v627_v34 }
 0x26b   : > { %v650_v36 = vsub.f32 %v619_v3, %v644_v35 }
 0x26c   : > { %v630_v37 = vpop.xlane.xlu0 %629 }
 0x26d   : > { %v645_v38 = vmul.f32 0.03125, %v630_v37  ;;  %v656_v39 = vmul.f32 %v650_v36, %v650_v36 }
 0x26f   : > { %v651_v40 = vsub.f32 %v620_v13, %v645_v38  ;;  %v662_v10 = vsel %vm361_vm1, %v656_v39, 0.0 }
 0x270   : > { %v633_v41 = vpop.xlane.xlu1 %632  ;;  %663 = vadd.xlane.f32.xlu0 %v662_v10 }
 0x271   : > { %v646_v42 = vmul.f32 0.03125, %v633_v41  ;;  %v657_v11 = vmul.f32 %v651_v40, %v651_v40 }
 0x273   : > { %v652_v43 = vsub.f32 %v621_v23, %v646_v42  ;;  %v665_v44 = vsel %vm361_vm1, %v657_v11, 0.0 }
 0x274   : > { %v636_v45 = vpop.xlane.xlu1 %635  ;;  %666 = vadd.xlane.f32.xlu1 %v665_v44 }
 0x275   : > { %v647_v46 = vmul.f32 0.03125, %v636_v45  ;;  %v658_v47 = vmul.f32 %v652_v43, %v652_v43 }
 0x277   : > { %v653_v48 = vsub.f32 %v622_v26, %v647_v46  ;;  %v668_v49 = vsel %vm361_vm1, %v658_v47, 0.0 }
 0x278   : > { %669 = vadd.xlane.f32.xlu0 %v668_v49  ;;  %v639_v50 = vpop.xlane.xlu0 %638 }
 0x279   : > { %v648_v51 = vmul.f32 0.03125, %v639_v50  ;;  %v659_v52 = vmul.f32 %v653_v48, %v653_v48 }
 0x27a   : > { %v642_v53 = vpop.xlane.xlu1 %641 }
 0x27b   : > { %v654_v54 = vsub.f32 %v623_v31, %v648_v51  ;;  %v649_v55 = vmul.f32 0.03125, %v642_v53  ;;  %v671_v56 = vsel %vm361_vm1, %v659_v52, 0.0 }
 0x27c   : > { %672 = vadd.xlane.f32.xlu1 %v671_v56 }
 0x27d   : > { %v655_v57 = vsub.f32 %v624_v33, %v649_v55  ;;  %v660_v58 = vmul.f32 %v654_v54, %v654_v54 }
 0x27f   : > { %v674_v59 = vsel %vm361_vm1, %v660_v58, 0.0  ;;  %v661_v60 = vmul.f32 %v655_v57, %v655_v57 }
 0x280   : > { %675 = vadd.xlane.f32.xlu0 %v674_v59 }
 0x281   : > { %v677_v61 = vsel %vm361_vm1, %v661_v60, 0.0 }
 0x282   : > { %678 = vadd.xlane.f32.xlu1 %v677_v61 }
 0x2fd   : > { %v664_v62 = vpop.xlane.xlu0 %663 }
 0x2fe   : > { %v680_v63 = vmul.f32 0.03125, %v664_v62 }
 0x300   : > { %v686_v0 = vadd.f32 1e-05, %v680_v63 }
 0x301   : > { %v667_v1 = vpop.xlane.xlu1 %666 }
 0x302   : > { %951 = vrsqrt.f32 %v686_v0  ;;  %v681_v2 = vmul.f32 0.03125, %v667_v1 }
 0x304   : > { %v687_v3 = vadd.f32 1e-05, %v681_v2 }
 0x305   : > { %v670_v4 = vpop.xlane.xlu0 %669 }
 0x306   : > { %953 = vrsqrt.f32 %v687_v3  ;;  %v682_v8 = vmul.f32 0.03125, %v670_v4 }
 0x308   : > { %v688_v12 = vadd.f32 1e-05, %v682_v8 }
 0x309   : > { %v673_v13 = vpop.xlane.xlu1 %672 }
 0x30a   : > { %955 = vrsqrt.f32 %v688_v12  ;;  %v683_v14 = vmul.f32 0.03125, %v673_v13 }
 0x30c   : > { %v952_v15 = vpop.eup %951  ;;  %v689_v17 = vadd.f32 1e-05, %v683_v14 }
 0x30d   : > { %v698_v18 = vmul.f32 %v952_v15, %v650_v36  ;;  %v676_v19 = vpop.xlane.xlu0 %675 }
 0x30e   : > { %957 = vrsqrt.f32 %v689_v17  ;;  %v684_v20 = vmul.f32 0.03125, %v676_v19 }
 0x30f   : > { %v711_v21 = vmul.f32 %v866_v16, %v698_v18  ;;  %v679_v22 = vpop.xlane.xlu1 %678 }
 0x310   : > { %v954_v6 = vpop.eup %953  ;;  %v690_v23 = vadd.f32 1e-05, %v684_v20  ;;  %v685_v24 = vmul.f32 0.03125, %v679_v22 }
 0x311   : > { %v724_v25 = vadd.f32 %v867_v5, %v711_v21  ;;  %v699_v26 = vmul.f32 %v954_v6, %v651_v40 }
 0x312   : > { %959 = vrsqrt.f32 %v690_v23  ;;  %v691_v27 = vadd.f32 1e-05, %v685_v24 }
 0x313   : > { %730 = vst.msk [vmem:[%s1175_s13] sm:$0xff] %vm361_vm1, %v724_v25  ;;  %v712_v28 = vmul.f32 %v866_v16, %v699_v26 }
 0x314   : > { %v956_v29 = vpop.eup %955  ;;  %961 = vrsqrt.f32 %v691_v27 }
 0x315   : > { %v725_v30 = vadd.f32 %v867_v5, %v712_v28  ;;  %v700_v31 = vmul.f32 %v956_v29, %v652_v43 }
 0x317   : > { %731 = vst.msk [vmem:[%s1175_s13 + $0x8] sm:$0xff] %vm361_vm1, %v725_v30  ;;  %v713_v7 = vmul.f32 %v866_v16, %v700_v31 }
 0x318   : > { %v958_v32 = vpop.eup %957 }
 0x319   : > { %v726_v33 = vadd.f32 %v867_v5, %v713_v7  ;;  %v701_v9 = vmul.f32 %v958_v32, %v653_v48 }
 0x31b   : > { %732 = vst.msk [vmem:[%s1175_s13 + $0x10] sm:$0xff] %vm361_vm1, %v726_v33  ;;  %v714_v34 = vmul.f32 %v866_v16, %v701_v9 }
 0x31c   : > { %v960_v35 = vpop.eup %959 }
 0x31d   : > { %v727_v36 = vadd.f32 %v867_v5, %v714_v34  ;;  %v702_v37 = vmul.f32 %v960_v35, %v654_v54 }
 0x31e   : > { %v962_v38 = vpop.eup %961 }
 0x31f   : > { %733 = vst.msk [vmem:[%s1175_s13 + $0x18] sm:$0xff] %vm361_vm1, %v727_v36  ;;  %v715_v39 = vmul.f32 %v866_v16, %v702_v37  ;;  %v703_v40 = vmul.f32 %v962_v38, %v655_v57 }
 0x321   : > { %v728_v10 = vadd.f32 %v867_v5, %v715_v39  ;;  %v716_v41 = vmul.f32 %v866_v16, %v703_v40 }
 0x323   : > { %734 = vst.msk [vmem:[%s1175_s13 + $0x20] sm:$0xff] %vm361_vm1, %v728_v10  ;;  %v729_v42 = vadd.f32 %v867_v5, %v716_v41 }
 0x325   : > { %735 = vst.msk [vmem:[%s1175_s13 + $0x28] sm:$0xff] %vm361_vm1, %v729_v42 }
 0x326 PF: > { %s17_s26 = sadd.s32 1, %s985_s26   ;;  %s1206_s24 = smov %s981_s25 }
 0x327   : > { %p14_p5 = scmp.ge.s32.totalorder %s17_s26, 4   ;;  %s1207_s25 = smov %s1209_s27 }
 0x329   :  { %16 = sbr.rel (!%p14_p5) target bundleno = 2 (0x2), region = 95 }

</bundles_post_ra>
